<compile_context>
chip_gen: v7x
topology: tpu7x:2x2x1
jax: 0.10.0
libtpu: 0.0.40
codegen_flags: <defaults>
</compile_context>

<pallas_src>
import functools

import jax
import jax.numpy as jnp
from jax.experimental import pallas as pl
from jax.experimental.pallas import tpu as pltpu


# --------------------------------------------------------------------------
# Fused Pallas kernel (single launch, no grid — whole batch resident)
# --------------------------------------------------------------------------

def _fused_criterion_kernel(
    # SMEM scalar inputs
    bidx_ref,     # (P,)      int32  matched batch index per pair
    sidx_ref,     # (P,)      int32  matched query index per pair
    tspan_ref,    # (2*P,)    f32    matched target spans, flattened [cx0,w0,cx1,w1,...]
    # VMEM inputs (lane-dense on Q / L / D)
    span_cx_ref,  # (B, Q)    float  predicted span centers
    span_w_ref,   # (B, Q)    float  predicted span widths
    logit_fg_ref, # (B, Q)    float  foreground logit
    logit_bg_ref, # (B, Q)    float  background logit
    sal_ref,      # (B, L)    float  saliency scores
    pos_ref,      # (B, PS)   int32  saliency positive clip indices
    neg_ref,      # (B, PS)   int32  saliency negative clip indices
    img_ref,      # (B, Q, D) float  proj_queries
    txtsum_ref,   # (B, 1, D) f32    proj_txt_mem pre-summed over text tokens
    # SMEM output
    out_ref,      # (8,) f32  [span, giou, label, class_err, saliency, contrastive, 0, 0]
    *, B, Q, P, PS, eos_coef, margin, inv_temp, inv_bq, inv_p, inv_p2,
    sal_scale, inv_b):
    f32 = jnp.float32

    # ---- matched-pair masks: one flat-index compare per pair, all (B, Q) -------
    bio = jax.lax.broadcasted_iota(jnp.int32, (B, Q), 0)
    qio = jax.lax.broadcasted_iota(jnp.int32, (B, Q), 1)
    flat = bio * Q + qio                                   # (B, Q) int32

    def pair_body(p, carry):
        fgm, tcx, tw = carry
        sel = flat == (bidx_ref[p] * Q + sidx_ref[p])      # single compare
        return (jnp.where(sel, 1.0, fgm),
                jnp.where(sel, tspan_ref[2 * p], tcx),
                jnp.where(sel, tspan_ref[2 * p + 1], tw))

    zeros_bq = jnp.zeros((B, Q), f32)
    carry = (zeros_bq, zeros_bq, zeros_bq)
    if P <= 8:                                             # small static P: unroll
        for p in range(P):
            carry = pair_body(p, carry)
    else:                                                  # large P: bounded live ranges
        carry = jax.lax.fori_loop(0, P, pair_body, carry, unroll=4)
    fgm, tgt_cx, tgt_w = carry                             # fgm is a 0/1 f32 mask
    fg = fgm > 0.5

    # ---- loss_span (L1) + loss_giou --------------------------------------------
    scx = span_cx_ref[...].astype(f32)
    sw = span_w_ref[...].astype(f32)
    l1_map = jnp.abs(scx - tgt_cx) + jnp.abs(sw - tgt_w)
    loss_span = jnp.sum(fgm * l1_map) * inv_p2

    s1 = scx - 0.5 * sw
    e1 = scx + 0.5 * sw
    s2 = tgt_cx - 0.5 * tgt_w
    e2 = tgt_cx + 0.5 * tgt_w
    inter = jnp.maximum(jnp.minimum(e1, e2) - jnp.maximum(s1, s2), 0.0)
    union = (e1 - s1) + (e2 - s2) - inter
    enclose = jnp.maximum(e1, e2) - jnp.minimum(s1, s2)    # unclamped (matches reference)
    # Guard only the unmatched (masked-out) positions against 0-denominators.
    union_g = jnp.where(fg, union, 1.0)
    enclose_g = jnp.where(fg, enclose, 1.0)
    giou = inter * pl.reciprocal(union_g, approx=True) \
        - (enclose - union) * pl.reciprocal(enclose_g, approx=True)
    loss_giou = jnp.sum(fgm * (1.0 - giou)) * inv_p

    # ---- loss_label (weighted 2-class CE, one exp) + class_error ----------------
    l0 = logit_fg_ref[...].astype(f32)
    l1 = logit_bg_ref[...].astype(f32)
    m = jnp.maximum(l0, l1)
    lse2 = m + jnp.log(1.0 + jnp.exp(-jnp.abs(l0 - l1)))
    nll = lse2 - jnp.where(fg, l0, l1)
    w = eos_coef + (1.0 - eos_coef) * fgm                  # empty_weight = [1, eos_coef]
    loss_label = jnp.sum(w * nll) * inv_bq                 # mean over B*Q (reduction='none')

    correct = jnp.sum(jnp.where(fg & (l0 >= l1), 1.0, 0.0))
    class_error = 100.0 - 100.0 * correct * inv_p          # #matched == P (static)

    # ---- loss_saliency (hinge), lane one-hot gather over the clip axis ----------
    sal = sal_ref[...].astype(f32)                         # (B, L), L on lanes
    L = sal.shape[1]
    clip_iota = jax.lax.broadcasted_iota(jnp.int32, (B, L), 1)
    hinge = jnp.float32(0.0)
    for k in range(PS):                                    # PS is small & static
        pos_col = pos_ref[:, k:k + 1]                      # (B, 1) int32
        neg_col = neg_ref[:, k:k + 1]
        pos_s = jnp.sum(jnp.where(clip_iota == pos_col, sal, 0.0), axis=1, keepdims=True)
        neg_s = jnp.sum(jnp.where(clip_iota == neg_col, sal, 0.0), axis=1, keepdims=True)
        hinge = hinge + jnp.sum(jnp.maximum(margin + neg_s - pos_s, 0.0))
    loss_saliency = hinge * sal_scale

    # ---- loss_contrastive_align (NCE); sum_n logits == <img, sum_n txt> ---------
    img = img_ref[...].astype(f32)                         # (B, Q, D)
    tsum = txtsum_ref[...].astype(f32)                     # (B, 1, D)
    s = jnp.sum(img * tsum, axis=2) * inv_temp             # (B, Q), lane-dense on Q
    posm = fgm
    pos_term = jnp.sum(s * posm, axis=1, keepdims=True)    # (B, 1)
    num_pos = jnp.maximum(jnp.sum(posm, axis=1, keepdims=True), 1.0)
    smax = jnp.max(s, axis=1, keepdims=True)
    lse_s = smax + jnp.log(jnp.sum(jnp.exp(s - smax), axis=1, keepdims=True))
    loss_nce = lse_s - pos_term * pl.reciprocal(num_pos, approx=True)
    loss_contrastive = jnp.sum(loss_nce) * inv_b

    # ---- six scalar stores to the SMEM output -----------------------------------
    out_ref[0] = loss_span
    out_ref[1] = loss_giou
    out_ref[2] = loss_label
    out_ref[3] = class_error
    out_ref[4] = loss_saliency
    out_ref[5] = loss_contrastive
    out_ref[6] = jnp.float32(0.0)
    out_ref[7] = jnp.float32(0.0)


# --------------------------------------------------------------------------
# Wrapper (single pallas_call, no grid)
# --------------------------------------------------------------------------

def fused_criterion_losses(pred_logits, pred_spans, tgt_spans, saliency_scores,
                           proj_queries, proj_txt_mem,
                           batch_idx, src_idx, pos_idx, neg_idx,
                           *, eos_coef, temperature, saliency_margin):
    B, Q, _ = pred_logits.shape
    D = proj_queries.shape[-1]
    L = saliency_scores.shape[-1]
    P = int(tgt_spans.shape[0])
    PS = int(pos_idx.shape[1])
    assert P > 0
    # NOTE: assumes the matcher never emits duplicate (batch, query) pairs
    # (true for identity / Hungarian matching).

    # Lane-dense (B, Q) slabs — layout plumbing only, no wrapper-side compute.
    span_cx = pred_spans[..., 0]
    span_w = pred_spans[..., 1]
    logit_fg = pred_logits[..., 0]
    logit_bg = pred_logits[..., 1]
    # Text tokens pre-reduced (sum over N commutes with the <img, txt> dot):
    # cuts that operand's DMA / VMEM footprint by N x.
    txt_sum = jnp.sum(proj_txt_mem.astype(jnp.float32), axis=1, keepdims=True)  # (B,1,D)

    kernel = functools.partial(
        _fused_criterion_kernel,
        B=B, Q=Q, P=P, PS=PS,
        eos_coef=float(eos_coef),
        margin=float(saliency_margin),
        inv_temp=1.0 / float(temperature),
        inv_bq=1.0 / float(B * Q),
        inv_p=1.0 / float(P),
        inv_p2=1.0 / float(P * 2),
        sal_scale=2.0 / float(B * PS),
        inv_b=1.0 / float(B),
    )

    smem = pl.BlockSpec(memory_space=pltpu.MemorySpace.SMEM)
    vmem = pl.BlockSpec(memory_space=pltpu.MemorySpace.VMEM)

    operands = (
        batch_idx.astype(jnp.int32),                       # SMEM
        src_idx.astype(jnp.int32),                         # SMEM
        tgt_spans.reshape(-1).astype(jnp.float32),         # SMEM
        span_cx, span_w, logit_fg, logit_bg,               # VMEM (bf16 or f32 accepted)
        saliency_scores,                                   # VMEM
        pos_idx.astype(jnp.int32),                         # VMEM (B, PS)
        neg_idx.astype(jnp.int32),                         # VMEM (B, PS)
        proj_queries,                                      # VMEM (B, Q, D)
        txt_sum,                                           # VMEM (B, 1, D) f32
    )

    bytes_accessed = sum(int(x.size) * x.dtype.itemsize for x in operands) + 8 * 4
    cost = pl.CostEstimate(
        flops=2 * B * Q * D + 50 * B * Q + 8 * B * PS * L + 10 * P,
        transcendentals=2 * B * Q + 4 * B,
        bytes_accessed=bytes_accessed,
    )

    # TODO(synk): when proj_queries/proj_txt_mem reach tens of MiB (v7x 64 MiB /
    # v5e 16 MiB scoped VMEM), add a batch grid or set
    # pltpu.CompilerParams(vmem_limit_bytes=...) explicitly.
    out = pl.pallas_call(
        kernel,
        in_specs=[smem, smem, smem] + [vmem] * 9,
        out_specs=smem,
        out_shape=jax.ShapeDtypeStruct((8,), jnp.float32),
        cost_estimate=cost,
    )(*operands)

    return {
        'loss_span': out[0],
        'loss_giou': out[1],
        'loss_label': out[2],
        'class_error': out[3],
        'loss_saliency': out[4],
        'loss_contrastive_align': out[5],
    }


# --------------------------------------------------------------------------
# SetCriterion (forward only)
# --------------------------------------------------------------------------

class SetCriterionPallas:
    def __init__(self, weight_dict, eos_coef, losses, temperature,
                 span_loss_type, max_v_l, max_q_l, saliency_margin=1.0):
        self.weight_dict = weight_dict
        self.losses = losses
        self.temperature = temperature
        self.span_loss_type = span_loss_type
        self.max_v_l = max_v_l
        self.max_q_l = max_q_l
        self.saliency_margin = saliency_margin
        self.eos_coef = eos_coef
        self.foreground_label = 0
        self.background_label = 1
        # empty_weight buffer = [1, eos_coef]  (eos_coef is baked into the kernel)
        self.empty_weight = jnp.array([1.0, eos_coef], jnp.float32)

    @staticmethod
    def _get_src_permutation_idx(indices):
        batch_idx = jnp.concatenate(
            [jnp.full_like(src, i) for i, (src, _) in enumerate(indices)])
        src_idx = jnp.concatenate([src for src, _ in indices])
        return batch_idx, src_idx

    def forward(self, outputs, targets, epoch_i=0):
        # TODO(synk): Hungarian matcher / event_matcher are external modules with
        # data-dependent assignment; a deterministic identity matching is used here.
        indices = [(jnp.arange(t['spans'].shape[0], dtype=jnp.int32),
                    jnp.arange(t['spans'].shape[0], dtype=jnp.int32))
                   for t in targets['span_labels']]
        batch_idx, src_idx = self._get_src_permutation_idx(indices)

        assert self.span_loss_type == 'l1'  # TODO(synk): 'ce' span loss branch not implemented
        tgt_spans = jnp.concatenate(
            [t['spans'][i] for t, (_, i) in zip(targets['span_labels'], indices)],
            axis=0)                                                       # (P, 2)

        has_sal = 'saliency_pos_labels' in targets
        if has_sal:
            pos_idx = targets['saliency_pos_labels']
            neg_idx = targets['saliency_neg_labels']
        else:
            B = outputs['saliency_scores'].shape[0]
            pos_idx = jnp.zeros((B, 1), jnp.int32)
            neg_idx = jnp.zeros((B, 1), jnp.int32)

        all_losses = fused_criterion_losses(
            outputs['pred_logits'], outputs['pred_spans'], tgt_spans,
            outputs['saliency_scores'], outputs['proj_queries'], outputs['proj_txt_mem'],
            batch_idx, src_idx, pos_idx, neg_idx,
            eos_coef=self.eos_coef, temperature=self.temperature,
            saliency_margin=self.saliency_margin)

        key_map = {'spans': ('loss_span', 'loss_giou'),
                   'labels': ('loss_label', 'class_error'),
                   'saliency': ('loss_saliency',),
                   'contrastive_align': ('loss_contrastive_align',)}
        losses = {}
        for loss in self.losses:
            for k in key_map.get(loss, ()):
                losses[k] = all_losses[k]
        if 'saliency' in self.losses and not has_sal:
            losses['loss_saliency'] = 0

        # TODO(synk): 'event_spans', 'attention_weights_align' losses and the
        # aux_outputs loop require the external matchers / ragged per-sample loops.
        return losses


# --------------------------------------------------------------------------
# Pure-JAX reference (numerical sanity check)
# --------------------------------------------------------------------------

def _reference_losses(outputs, targets, batch_idx, src_idx, eos_coef, temperature, margin):
    ref = {}
    # spans
    src = outputs['pred_spans'][batch_idx, src_idx]
    tgt = jnp.concatenate([t['spans'] for t in targets['span_labels']], axis=0)
    ref['loss_span'] = jnp.mean(jnp.abs(src - tgt))
    s1, e1 = src[:, 0] - 0.5 * src[:, 1], src[:, 0] + 0.5 * src[:, 1]
    s2, e2 = tgt[:, 0] - 0.5 * tgt[:, 1], tgt[:, 0] + 0.5 * tgt[:, 1]
    inter = jnp.maximum(jnp.minimum(e1, e2) - jnp.maximum(s1, s2), 0.0)
    union = (e1 - s1) + (e2 - s2) - inter
    enclose = jnp.maximum(e1, e2) - jnp.minimum(s1, s2)
    giou = inter / union - (enclose - union) / enclose
    ref['loss_giou'] = jnp.mean(1.0 - giou)
    # labels
    logits = outputs['pred_logits']
    B, Q, _ = logits.shape
    tcls = jnp.ones((B, Q), jnp.int32).at[batch_idx, src_idx].set(0)
    logp = jax.nn.log_softmax(logits, axis=-1)
    nll = -jnp.take_along_axis(logp, tcls[:, :, None], axis=-1)[:, :, 0]
    w = jnp.where(tcls == 0, 1.0, eos_coef)
    ref['loss_label'] = jnp.mean(w * nll)
    matched_logits = logits[batch_idx, src_idx]
    acc = 100.0 * jnp.mean((jnp.argmax(matched_logits, axis=-1) == 0).astype(jnp.float32))
    ref['class_error'] = 100.0 - acc
    # saliency
    sc = outputs['saliency_scores']
    pos = jnp.take_along_axis(sc, targets['saliency_pos_labels'], axis=1)
    neg = jnp.take_along_axis(sc, targets['saliency_neg_labels'], axis=1)
    P = pos.shape[1]
    ref['loss_saliency'] = jnp.sum(jnp.maximum(margin + neg - pos, 0.0)) / (B * P) * 2.0
    # contrastive
    lg = jnp.einsum('bmd,bnd->bmn', outputs['proj_queries'], outputs['proj_txt_mem'])
    s = jnp.sum(lg, axis=2) / temperature
    pmap = jnp.zeros((B, Q), jnp.float32).at[batch_idx, src_idx].set(1.0)
    pos_term = jnp.sum(s * pmap, axis=1)
    num_pos = jnp.sum(pmap, axis=1)
    neg_term = jax.scipy.special.logsumexp(s, axis=1)
    ref['loss_contrastive_align'] = jnp.mean(-pos_term / num_pos + neg_term)
    return ref


# --------------------------------------------------------------------------
# Main
# --------------------------------------------------------------------------

if __name__ == "__main__":
    B, Q, NTXT, D, L = 2, 8, 8, 32, 16   # batch, #queries, #text tokens, hidden, #clips
    N_TGT = 2                            # ground-truth spans per batch element
    P_SAL = 2                            # saliency (pos, neg) pairs per batch element

    key = jax.random.PRNGKey(0)
    ks = jax.random.split(key, 8)

    def l2norm(x):
        return x / jnp.linalg.norm(x, axis=-1, keepdims=True)

    # model outputs (deterministic synthetic values)
    pred_logits = jax.random.normal(ks[0], (B, Q, 2), jnp.float32)
    cx = jax.random.uniform(ks[1], (B, Q), jnp.float32, 0.25, 0.75)
    w = jax.random.uniform(ks[2], (B, Q), jnp.float32, 0.05, 0.40)
    pred_spans = jnp.stack([cx, w], axis=-1)                         # (B, Q, 2) in (cx, w)
    proj_queries = l2norm(jax.random.normal(ks[3], (B, Q, D), jnp.float32))
    proj_txt_mem = l2norm(jax.random.normal(ks[4], (B, NTXT, D), jnp.float32))
    saliency_scores = jax.random.normal(ks[5], (B, L), jnp.float32)

    outputs = {
        'pred_logits': pred_logits,
        'pred_spans': pred_spans,
        'proj_queries': proj_queries,
        'proj_txt_mem': proj_txt_mem,
        'saliency_scores': saliency_scores,
    }

    # targets
    t_cx = jax.random.uniform(ks[6], (B, N_TGT), jnp.float32, 0.30, 0.70)
    t_w = jax.random.uniform(ks[7], (B, N_TGT), jnp.float32, 0.10, 0.30)
    tgt_spans = jnp.stack([t_cx, t_w], axis=-1)                      # (B, N_TGT, 2)
    targets = {
        'span_labels': [{'spans': tgt_spans[b]} for b in range(B)],
        'saliency_pos_labels': jnp.array([[2, 5], [1, 7]], jnp.int32),
        'saliency_neg_labels': jnp.array([[10, 12], [9, 14]], jnp.int32),
    }

    criterion = SetCriterionPallas(
        weight_dict={'loss_span': 10, 'loss_giou': 1, 'loss_label': 4,
                     'loss_saliency': 1, 'loss_contrastive_align': 0.02},
        eos_coef=0.1,
        losses=['spans', 'labels', 'saliency', 'contrastive_align'],
        temperature=0.07,
        span_loss_type='l1',
        max_v_l=75,
        max_q_l=32,
        saliency_margin=1.0,
    )

    losses = criterion.forward(outputs, targets, epoch_i=0)
    losses = {k: jax.block_until_ready(v) for k, v in losses.items()}

    # numerical sanity check against a pure-JAX reference
    bidx = jnp.repeat(jnp.arange(B), N_TGT)
    sidx = jnp.tile(jnp.arange(N_TGT), B)
    ref = _reference_losses(outputs, targets, bidx, sidx,
                            eos_coef=0.1, temperature=0.07, margin=1.0)
    for k, v in ref.items():
        assert jnp.allclose(losses[k], v, rtol=2e-3, atol=2e-3), (k, losses[k], v)

    print("KERNEL_OK")
</pallas_src>

<mosaic_0001>
module attributes {stable_mosaic.version = 11 : i64} {
  func.func @_fused_criterion_kernel(%arg0: memref<4xi32, #tpu.memory_space<smem>>, %arg1: memref<4xi32, #tpu.memory_space<smem>>, %arg2: memref<8xf32, #tpu.memory_space<smem>>, %arg3: memref<2x8xf32, #tpu.memory_space<vmem>>, %arg4: memref<2x8xf32, #tpu.memory_space<vmem>>, %arg5: memref<2x8xf32, #tpu.memory_space<vmem>>, %arg6: memref<2x8xf32, #tpu.memory_space<vmem>>, %arg7: memref<2x16xf32, #tpu.memory_space<vmem>>, %arg8: memref<2x2xi32, #tpu.memory_space<vmem>>, %arg9: memref<2x2xi32, #tpu.memory_space<vmem>>, %arg10: memref<2x8x32xf32, #tpu.memory_space<vmem>>, %arg11: memref<2x1x32xf32, #tpu.memory_space<vmem>>, %arg12: memref<8xf32, #tpu.memory_space<smem>>) attributes {dimension_semantics = [], scalar_prefetch = 0 : i64, scratch_operands = 0 : i64, tpu.core_type = #tpu.core_type<tc>} {
    %0 = tpu.iota {dimensions = array<i32: 0>} : vector<2x8xi32>
    %1 = tpu.iota {dimensions = array<i32: 1>} : vector<2x8xi32>
    %c8_i32 = arith.constant 8 : i32
    %2 = vector.broadcast %c8_i32 : i32 to vector<2x8xi32>
    %3 = arith.muli %0, %2 : vector<2x8xi32>
    %4 = arith.addi %3, %1 : vector<2x8xi32>
    %cst = arith.constant 0.000000e+00 : f32
    %5 = vector.broadcast %cst : f32 to vector<2x8xf32>
    %c0 = arith.constant 0 : index
    %6 = memref.load %arg0[%c0] : memref<4xi32, #tpu.memory_space<smem>>
    %c8_i32_0 = arith.constant 8 : i32
    %7 = arith.muli %6, %c8_i32_0 : i32
    %c0_1 = arith.constant 0 : index
    %8 = memref.load %arg1[%c0_1] : memref<4xi32, #tpu.memory_space<smem>>
    %9 = arith.addi %7, %8 : i32
    %10 = vector.broadcast %9 : i32 to vector<2x8xi32>
    %11 = arith.cmpi eq, %4, %10 : vector<2x8xi32>
    %cst_2 = arith.constant 1.000000e+00 : f32
    %12 = vector.broadcast %cst_2 : f32 to vector<2x8xf32>
    %13 = arith.select %11, %12, %5 : vector<2x8xi1>, vector<2x8xf32>
    %c0_3 = arith.constant 0 : index
    %14 = memref.load %arg2[%c0_3] : memref<8xf32, #tpu.memory_space<smem>>
    %15 = vector.broadcast %14 : f32 to vector<2x8xf32>
    %16 = arith.select %11, %15, %5 : vector<2x8xi1>, vector<2x8xf32>
    %c1 = arith.constant 1 : index
    %17 = memref.load %arg2[%c1] : memref<8xf32, #tpu.memory_space<smem>>
    %18 = vector.broadcast %17 : f32 to vector<2x8xf32>
    %19 = arith.select %11, %18, %5 : vector<2x8xi1>, vector<2x8xf32>
    %c1_4 = arith.constant 1 : index
    %20 = memref.load %arg0[%c1_4] : memref<4xi32, #tpu.memory_space<smem>>
    %c8_i32_5 = arith.constant 8 : i32
    %21 = arith.muli %20, %c8_i32_5 : i32
    %c1_6 = arith.constant 1 : index
    %22 = memref.load %arg1[%c1_6] : memref<4xi32, #tpu.memory_space<smem>>
    %23 = arith.addi %21, %22 : i32
    %24 = vector.broadcast %23 : i32 to vector<2x8xi32>
    %25 = arith.cmpi eq, %4, %24 : vector<2x8xi32>
    %cst_7 = arith.constant 1.000000e+00 : f32
    %26 = vector.broadcast %cst_7 : f32 to vector<2x8xf32>
    %27 = arith.select %25, %26, %13 : vector<2x8xi1>, vector<2x8xf32>
    %c2 = arith.constant 2 : index
    %28 = memref.load %arg2[%c2] : memref<8xf32, #tpu.memory_space<smem>>
    %29 = vector.broadcast %28 : f32 to vector<2x8xf32>
    %30 = arith.select %25, %29, %16 : vector<2x8xi1>, vector<2x8xf32>
    %c3 = arith.constant 3 : index
    %31 = memref.load %arg2[%c3] : memref<8xf32, #tpu.memory_space<smem>>
    %32 = vector.broadcast %31 : f32 to vector<2x8xf32>
    %33 = arith.select %25, %32, %19 : vector<2x8xi1>, vector<2x8xf32>
    %c2_8 = arith.constant 2 : index
    %34 = memref.load %arg0[%c2_8] : memref<4xi32, #tpu.memory_space<smem>>
    %c8_i32_9 = arith.constant 8 : i32
    %35 = arith.muli %34, %c8_i32_9 : i32
    %c2_10 = arith.constant 2 : index
    %36 = memref.load %arg1[%c2_10] : memref<4xi32, #tpu.memory_space<smem>>
    %37 = arith.addi %35, %36 : i32
    %38 = vector.broadcast %37 : i32 to vector<2x8xi32>
    %39 = arith.cmpi eq, %4, %38 : vector<2x8xi32>
    %cst_11 = arith.constant 1.000000e+00 : f32
    %40 = vector.broadcast %cst_11 : f32 to vector<2x8xf32>
    %41 = arith.select %39, %40, %27 : vector<2x8xi1>, vector<2x8xf32>
    %c4 = arith.constant 4 : index
    %42 = memref.load %arg2[%c4] : memref<8xf32, #tpu.memory_space<smem>>
    %43 = vector.broadcast %42 : f32 to vector<2x8xf32>
    %44 = arith.select %39, %43, %30 : vector<2x8xi1>, vector<2x8xf32>
    %c5 = arith.constant 5 : index
    %45 = memref.load %arg2[%c5] : memref<8xf32, #tpu.memory_space<smem>>
    %46 = vector.broadcast %45 : f32 to vector<2x8xf32>
    %47 = arith.select %39, %46, %33 : vector<2x8xi1>, vector<2x8xf32>
    %c3_12 = arith.constant 3 : index
    %48 = memref.load %arg0[%c3_12] : memref<4xi32, #tpu.memory_space<smem>>
    %c8_i32_13 = arith.constant 8 : i32
    %49 = arith.muli %48, %c8_i32_13 : i32
    %c3_14 = arith.constant 3 : index
    %50 = memref.load %arg1[%c3_14] : memref<4xi32, #tpu.memory_space<smem>>
    %51 = arith.addi %49, %50 : i32
    %52 = vector.broadcast %51 : i32 to vector<2x8xi32>
    %53 = arith.cmpi eq, %4, %52 : vector<2x8xi32>
    %cst_15 = arith.constant 1.000000e+00 : f32
    %54 = vector.broadcast %cst_15 : f32 to vector<2x8xf32>
    %55 = arith.select %53, %54, %41 : vector<2x8xi1>, vector<2x8xf32>
    %c6 = arith.constant 6 : index
    %56 = memref.load %arg2[%c6] : memref<8xf32, #tpu.memory_space<smem>>
    %57 = vector.broadcast %56 : f32 to vector<2x8xf32>
    %58 = arith.select %53, %57, %44 : vector<2x8xi1>, vector<2x8xf32>
    %c7 = arith.constant 7 : index
    %59 = memref.load %arg2[%c7] : memref<8xf32, #tpu.memory_space<smem>>
    %60 = vector.broadcast %59 : f32 to vector<2x8xf32>
    %61 = arith.select %53, %60, %47 : vector<2x8xi1>, vector<2x8xf32>
    %cst_16 = arith.constant 5.000000e-01 : f32
    %62 = vector.broadcast %cst_16 : f32 to vector<2x8xf32>
    %63 = arith.cmpf ogt, %55, %62 : vector<2x8xf32>
    %c0_17 = arith.constant 0 : index
    %c0_18 = arith.constant 0 : index
    %64 = vector.load %arg3[%c0_17, %c0_18] : memref<2x8xf32, #tpu.memory_space<vmem>>, vector<2x8xf32>
    %c0_19 = arith.constant 0 : index
    %c0_20 = arith.constant 0 : index
    %65 = vector.load %arg4[%c0_19, %c0_20] : memref<2x8xf32, #tpu.memory_space<vmem>>, vector<2x8xf32>
    %66 = arith.subf %64, %58 : vector<2x8xf32>
    %67 = math.absf %66 : vector<2x8xf32>
    %68 = arith.subf %65, %61 : vector<2x8xf32>
    %69 = math.absf %68 : vector<2x8xf32>
    %70 = arith.addf %67, %69 : vector<2x8xf32>
    %71 = arith.mulf %55, %70 : vector<2x8xf32>
    %72 = vector.shape_cast %71 : vector<2x8xf32> to vector<1x2x8xf32>
    %cst_21 = arith.constant dense<0.000000e+00> : vector<1xf32>
    %73 = vector.multi_reduction <add>, %72, %cst_21 [1, 2] : vector<1x2x8xf32> to vector<1xf32>
    %74 = vector.shape_cast %73 : vector<1xf32> to vector<1x1x1xf32>
    %75 = vector.extract %74[0, 0, 0] : f32 from vector<1x1x1xf32>
    %cst_22 = arith.constant 1.250000e-01 : f32
    %76 = arith.mulf %75, %cst_22 : f32
    %cst_23 = arith.constant 5.000000e-01 : f32
    %77 = vector.broadcast %cst_23 : f32 to vector<2x8xf32>
    %78 = arith.mulf %77, %65 : vector<2x8xf32>
    %79 = arith.subf %64, %78 : vector<2x8xf32>
    %cst_24 = arith.constant 5.000000e-01 : f32
    %80 = vector.broadcast %cst_24 : f32 to vector<2x8xf32>
    %81 = arith.mulf %80, %65 : vector<2x8xf32>
    %82 = arith.addf %64, %81 : vector<2x8xf32>
    %cst_25 = arith.constant 5.000000e-01 : f32
    %83 = vector.broadcast %cst_25 : f32 to vector<2x8xf32>
    %84 = arith.mulf %83, %61 : vector<2x8xf32>
    %85 = arith.subf %58, %84 : vector<2x8xf32>
    %cst_26 = arith.constant 5.000000e-01 : f32
    %86 = vector.broadcast %cst_26 : f32 to vector<2x8xf32>
    %87 = arith.mulf %86, %61 : vector<2x8xf32>
    %88 = arith.addf %58, %87 : vector<2x8xf32>
    %89 = arith.minimumf %82, %88 : vector<2x8xf32>
    %90 = arith.maximumf %79, %85 : vector<2x8xf32>
    %91 = arith.subf %89, %90 : vector<2x8xf32>
    %cst_27 = arith.constant 0.000000e+00 : f32
    %92 = vector.broadcast %cst_27 : f32 to vector<2x8xf32>
    %93 = arith.maximumf %91, %92 : vector<2x8xf32>
    %94 = arith.subf %82, %79 : vector<2x8xf32>
    %95 = arith.subf %88, %85 : vector<2x8xf32>
    %96 = arith.addf %94, %95 : vector<2x8xf32>
    %97 = arith.subf %96, %93 : vector<2x8xf32>
    %98 = arith.maximumf %82, %88 : vector<2x8xf32>
    %99 = arith.minimumf %79, %85 : vector<2x8xf32>
    %100 = arith.subf %98, %99 : vector<2x8xf32>
    %cst_28 = arith.constant 1.000000e+00 : f32
    %101 = vector.broadcast %cst_28 : f32 to vector<2x8xf32>
    %102 = arith.select %63, %97, %101 : vector<2x8xi1>, vector<2x8xf32>
    %cst_29 = arith.constant 1.000000e+00 : f32
    %103 = vector.broadcast %cst_29 : f32 to vector<2x8xf32>
    %104 = arith.select %63, %100, %103 : vector<2x8xi1>, vector<2x8xf32>
    %105 = tpu.reciprocal %102 {approx = true} : vector<2x8xf32> -> vector<2x8xf32>
    %106 = arith.mulf %93, %105 : vector<2x8xf32>
    %107 = arith.subf %100, %97 : vector<2x8xf32>
    %108 = tpu.reciprocal %104 {approx = true} : vector<2x8xf32> -> vector<2x8xf32>
    %109 = arith.mulf %107, %108 : vector<2x8xf32>
    %110 = arith.subf %106, %109 : vector<2x8xf32>
    %cst_30 = arith.constant 1.000000e+00 : f32
    %111 = vector.broadcast %cst_30 : f32 to vector<2x8xf32>
    %112 = arith.subf %111, %110 : vector<2x8xf32>
    %113 = arith.mulf %55, %112 : vector<2x8xf32>
    %114 = vector.shape_cast %113 : vector<2x8xf32> to vector<1x2x8xf32>
    %cst_31 = arith.constant dense<0.000000e+00> : vector<1xf32>
    %115 = vector.multi_reduction <add>, %114, %cst_31 [1, 2] : vector<1x2x8xf32> to vector<1xf32>
    %116 = vector.shape_cast %115 : vector<1xf32> to vector<1x1x1xf32>
    %117 = vector.extract %116[0, 0, 0] : f32 from vector<1x1x1xf32>
    %cst_32 = arith.constant 2.500000e-01 : f32
    %118 = arith.mulf %117, %cst_32 : f32
    %c0_33 = arith.constant 0 : index
    %c0_34 = arith.constant 0 : index
    %119 = vector.load %arg5[%c0_33, %c0_34] : memref<2x8xf32, #tpu.memory_space<vmem>>, vector<2x8xf32>
    %c0_35 = arith.constant 0 : index
    %c0_36 = arith.constant 0 : index
    %120 = vector.load %arg6[%c0_35, %c0_36] : memref<2x8xf32, #tpu.memory_space<vmem>>, vector<2x8xf32>
    %121 = arith.maximumf %119, %120 : vector<2x8xf32>
    %122 = arith.subf %119, %120 : vector<2x8xf32>
    %123 = math.absf %122 : vector<2x8xf32>
    %cst_37 = arith.constant 0.000000e+00 : f32
    %124 = vector.broadcast %cst_37 : f32 to vector<2x8xf32>
    %125 = arith.subf %124, %123 : vector<2x8xf32>
    %126 = math.exp %125 : vector<2x8xf32>
    %cst_38 = arith.constant 1.000000e+00 : f32
    %127 = vector.broadcast %cst_38 : f32 to vector<2x8xf32>
    %128 = arith.addf %127, %126 : vector<2x8xf32>
    %129 = math.log %128 : vector<2x8xf32>
    %130 = arith.addf %121, %129 : vector<2x8xf32>
    %131 = arith.select %63, %119, %120 : vector<2x8xi1>, vector<2x8xf32>
    %132 = arith.subf %130, %131 : vector<2x8xf32>
    %cst_39 = arith.constant 0.899999976 : f32
    %133 = vector.broadcast %cst_39 : f32 to vector<2x8xf32>
    %134 = arith.mulf %133, %55 : vector<2x8xf32>
    %cst_40 = arith.constant 1.000000e-01 : f32
    %135 = vector.broadcast %cst_40 : f32 to vector<2x8xf32>
    %136 = arith.addf %135, %134 : vector<2x8xf32>
    %137 = arith.mulf %136, %132 : vector<2x8xf32>
    %138 = vector.shape_cast %137 : vector<2x8xf32> to vector<1x2x8xf32>
    %cst_41 = arith.constant dense<0.000000e+00> : vector<1xf32>
    %139 = vector.multi_reduction <add>, %138, %cst_41 [1, 2] : vector<1x2x8xf32> to vector<1xf32>
    %140 = vector.shape_cast %139 : vector<1xf32> to vector<1x1x1xf32>
    %141 = vector.extract %140[0, 0, 0] : f32 from vector<1x1x1xf32>
    %cst_42 = arith.constant 6.250000e-02 : f32
    %142 = arith.mulf %141, %cst_42 : f32
    %143 = arith.cmpf oge, %119, %120 : vector<2x8xf32>
    %144 = arith.andi %63, %143 : vector<2x8xi1>
    %cst_43 = arith.constant 1.000000e+00 : f32
    %cst_44 = arith.constant 0.000000e+00 : f32
    %145 = vector.broadcast %cst_43 : f32 to vector<2x8xf32>
    %146 = vector.broadcast %cst_44 : f32 to vector<2x8xf32>
    %147 = arith.select %144, %145, %146 : vector<2x8xi1>, vector<2x8xf32>
    %148 = vector.shape_cast %147 : vector<2x8xf32> to vector<1x2x8xf32>
    %cst_45 = arith.constant dense<0.000000e+00> : vector<1xf32>
    %149 = vector.multi_reduction <add>, %148, %cst_45 [1, 2] : vector<1x2x8xf32> to vector<1xf32>
    %150 = vector.shape_cast %149 : vector<1xf32> to vector<1x1x1xf32>
    %151 = vector.extract %150[0, 0, 0] : f32 from vector<1x1x1xf32>
    %cst_46 = arith.constant 1.000000e+02 : f32
    %152 = arith.mulf %cst_46, %151 : f32
    %cst_47 = arith.constant 2.500000e-01 : f32
    %153 = arith.mulf %152, %cst_47 : f32
    %cst_48 = arith.constant 1.000000e+02 : f32
    %154 = arith.subf %cst_48, %153 : f32
    %c0_49 = arith.constant 0 : index
    %c0_50 = arith.constant 0 : index
    %155 = vector.load %arg7[%c0_49, %c0_50] : memref<2x16xf32, #tpu.memory_space<vmem>>, vector<2x16xf32>
    %156 = tpu.iota {dimensions = array<i32: 1>} : vector<2x16xi32>
    %c0_51 = arith.constant 0 : index
    %c0_52 = arith.constant 0 : index
    %157 = vector.load %arg8[%c0_51, %c0_52] : memref<2x2xi32, #tpu.memory_space<vmem>>, vector<2x1xi32>
    %c0_53 = arith.constant 0 : index
    %c0_54 = arith.constant 0 : index
    %158 = vector.load %arg9[%c0_53, %c0_54] : memref<2x2xi32, #tpu.memory_space<vmem>>, vector<2x1xi32>
    %159 = vector.broadcast %157 : vector<2x1xi32> to vector<2x16xi32>
    %160 = arith.cmpi eq, %156, %159 : vector<2x16xi32>
    %cst_55 = arith.constant 0.000000e+00 : f32
    %161 = vector.broadcast %cst_55 : f32 to vector<2x16xf32>
    %162 = arith.select %160, %155, %161 : vector<2x16xi1>, vector<2x16xf32>
    %cst_56 = arith.constant dense<0.000000e+00> : vector<2xf32>
    %163 = vector.multi_reduction <add>, %162, %cst_56 [1] : vector<2x16xf32> to vector<2xf32>
    %164 = vector.shape_cast %163 : vector<2xf32> to vector<2x1xf32>
    %165 = vector.broadcast %158 : vector<2x1xi32> to vector<2x16xi32>
    %166 = arith.cmpi eq, %156, %165 : vector<2x16xi32>
    %cst_57 = arith.constant 0.000000e+00 : f32
    %167 = vector.broadcast %cst_57 : f32 to vector<2x16xf32>
    %168 = arith.select %166, %155, %167 : vector<2x16xi1>, vector<2x16xf32>
    %cst_58 = arith.constant dense<0.000000e+00> : vector<2xf32>
    %169 = vector.multi_reduction <add>, %168, %cst_58 [1] : vector<2x16xf32> to vector<2xf32>
    %170 = vector.shape_cast %169 : vector<2xf32> to vector<2x1xf32>
    %cst_59 = arith.constant 1.000000e+00 : f32
    %171 = vector.broadcast %cst_59 : f32 to vector<2x1xf32>
    %172 = arith.addf %171, %170 : vector<2x1xf32>
    %173 = arith.subf %172, %164 : vector<2x1xf32>
    %cst_60 = arith.constant 0.000000e+00 : f32
    %174 = vector.broadcast %cst_60 : f32 to vector<2x1xf32>
    %175 = arith.maximumf %173, %174 : vector<2x1xf32>
    %176 = vector.shape_cast %175 : vector<2x1xf32> to vector<1x2x1xf32>
    %cst_61 = arith.constant dense<0.000000e+00> : vector<1xf32>
    %177 = vector.multi_reduction <add>, %176, %cst_61 [1, 2] : vector<1x2x1xf32> to vector<1xf32>
    %178 = vector.shape_cast %177 : vector<1xf32> to vector<1x1x1xf32>
    %179 = vector.extract %178[0, 0, 0] : f32 from vector<1x1x1xf32>
    %cst_62 = arith.constant 0.000000e+00 : f32
    %180 = arith.addf %cst_62, %179 : f32
    %c0_63 = arith.constant 0 : index
    %c1_64 = arith.constant 1 : index
    %181 = vector.load %arg8[%c0_63, %c1_64] : memref<2x2xi32, #tpu.memory_space<vmem>>, vector<2x1xi32>
    %c0_65 = arith.constant 0 : index
    %c1_66 = arith.constant 1 : index
    %182 = vector.load %arg9[%c0_65, %c1_66] : memref<2x2xi32, #tpu.memory_space<vmem>>, vector<2x1xi32>
    %183 = vector.broadcast %181 : vector<2x1xi32> to vector<2x16xi32>
    %184 = arith.cmpi eq, %156, %183 : vector<2x16xi32>
    %cst_67 = arith.constant 0.000000e+00 : f32
    %185 = vector.broadcast %cst_67 : f32 to vector<2x16xf32>
    %186 = arith.select %184, %155, %185 : vector<2x16xi1>, vector<2x16xf32>
    %cst_68 = arith.constant dense<0.000000e+00> : vector<2xf32>
    %187 = vector.multi_reduction <add>, %186, %cst_68 [1] : vector<2x16xf32> to vector<2xf32>
    %188 = vector.shape_cast %187 : vector<2xf32> to vector<2x1xf32>
    %189 = vector.broadcast %182 : vector<2x1xi32> to vector<2x16xi32>
    %190 = arith.cmpi eq, %156, %189 : vector<2x16xi32>
    %cst_69 = arith.constant 0.000000e+00 : f32
    %191 = vector.broadcast %cst_69 : f32 to vector<2x16xf32>
    %192 = arith.select %190, %155, %191 : vector<2x16xi1>, vector<2x16xf32>
    %cst_70 = arith.constant dense<0.000000e+00> : vector<2xf32>
    %193 = vector.multi_reduction <add>, %192, %cst_70 [1] : vector<2x16xf32> to vector<2xf32>
    %194 = vector.shape_cast %193 : vector<2xf32> to vector<2x1xf32>
    %cst_71 = arith.constant 1.000000e+00 : f32
    %195 = vector.broadcast %cst_71 : f32 to vector<2x1xf32>
    %196 = arith.addf %195, %194 : vector<2x1xf32>
    %197 = arith.subf %196, %188 : vector<2x1xf32>
    %cst_72 = arith.constant 0.000000e+00 : f32
    %198 = vector.broadcast %cst_72 : f32 to vector<2x1xf32>
    %199 = arith.maximumf %197, %198 : vector<2x1xf32>
    %200 = vector.shape_cast %199 : vector<2x1xf32> to vector<1x2x1xf32>
    %cst_73 = arith.constant dense<0.000000e+00> : vector<1xf32>
    %201 = vector.multi_reduction <add>, %200, %cst_73 [1, 2] : vector<1x2x1xf32> to vector<1xf32>
    %202 = vector.shape_cast %201 : vector<1xf32> to vector<1x1x1xf32>
    %203 = vector.extract %202[0, 0, 0] : f32 from vector<1x1x1xf32>
    %204 = arith.addf %180, %203 : f32
    %cst_74 = arith.constant 5.000000e-01 : f32
    %205 = arith.mulf %204, %cst_74 : f32
    %c0_75 = arith.constant 0 : index
    %c0_76 = arith.constant 0 : index
    %c0_77 = arith.constant 0 : index
    %206 = vector.load %arg10[%c0_75, %c0_76, %c0_77] : memref<2x8x32xf32, #tpu.memory_space<vmem>>, vector<2x8x32xf32>
    %c0_78 = arith.constant 0 : index
    %c0_79 = arith.constant 0 : index
    %c0_80 = arith.constant 0 : index
    %207 = vector.load %arg11[%c0_78, %c0_79, %c0_80] : memref<2x1x32xf32, #tpu.memory_space<vmem>>, vector<2x1x32xf32>
    %208 = vector.broadcast %207 : vector<2x1x32xf32> to vector<2x8x32xf32>
    %209 = arith.mulf %206, %208 : vector<2x8x32xf32>
    %cst_81 = arith.constant dense<0.000000e+00> : vector<2x8xf32>
    %210 = vector.multi_reduction <add>, %209, %cst_81 [2] : vector<2x8x32xf32> to vector<2x8xf32>
    %cst_82 = arith.constant 14.2857141 : f32
    %211 = vector.broadcast %cst_82 : f32 to vector<2x8xf32>
    %212 = arith.mulf %210, %211 : vector<2x8xf32>
    %213 = arith.mulf %212, %55 : vector<2x8xf32>
    %cst_83 = arith.constant dense<0.000000e+00> : vector<2xf32>
    %214 = vector.multi_reduction <add>, %213, %cst_83 [1] : vector<2x8xf32> to vector<2xf32>
    %215 = vector.shape_cast %214 : vector<2xf32> to vector<2x1xf32>
    %cst_84 = arith.constant dense<0.000000e+00> : vector<2xf32>
    %216 = vector.multi_reduction <add>, %55, %cst_84 [1] : vector<2x8xf32> to vector<2xf32>
    %217 = vector.shape_cast %216 : vector<2xf32> to vector<2x1xf32>
    %cst_85 = arith.constant 1.000000e+00 : f32
    %218 = vector.broadcast %cst_85 : f32 to vector<2x1xf32>
    %219 = arith.maximumf %217, %218 : vector<2x1xf32>
    %cst_86 = arith.constant dense<0xFF800000> : vector<2xf32>
    %220 = vector.multi_reduction <maximumf>, %212, %cst_86 [1] : vector<2x8xf32> to vector<2xf32>
    %221 = vector.shape_cast %220 : vector<2xf32> to vector<2x1xf32>
    %222 = vector.broadcast %221 : vector<2x1xf32> to vector<2x8xf32>
    %223 = arith.subf %212, %222 : vector<2x8xf32>
    %224 = math.exp %223 : vector<2x8xf32>
    %cst_87 = arith.constant dense<0.000000e+00> : vector<2xf32>
    %225 = vector.multi_reduction <add>, %224, %cst_87 [1] : vector<2x8xf32> to vector<2xf32>
    %226 = vector.shape_cast %225 : vector<2xf32> to vector<2x1xf32>
    %227 = math.log %226 : vector<2x1xf32>
    %228 = arith.addf %221, %227 : vector<2x1xf32>
    %229 = tpu.reciprocal %219 {approx = true} : vector<2x1xf32> -> vector<2x1xf32>
    %230 = arith.mulf %215, %229 : vector<2x1xf32>
    %231 = arith.subf %228, %230 : vector<2x1xf32>
    %232 = vector.shape_cast %231 : vector<2x1xf32> to vector<1x2x1xf32>
    %cst_88 = arith.constant dense<0.000000e+00> : vector<1xf32>
    %233 = vector.multi_reduction <add>, %232, %cst_88 [1, 2] : vector<1x2x1xf32> to vector<1xf32>
    %234 = vector.shape_cast %233 : vector<1xf32> to vector<1x1x1xf32>
    %235 = vector.extract %234[0, 0, 0] : f32 from vector<1x1x1xf32>
    %cst_89 = arith.constant 5.000000e-01 : f32
    %236 = arith.mulf %235, %cst_89 : f32
    %c0_90 = arith.constant 0 : index
    %237 = memref.load %arg12[%c0_90] : memref<8xf32, #tpu.memory_space<smem>>
    memref.store %76, %arg12[%c0_90] : memref<8xf32, #tpu.memory_space<smem>>
    %c1_91 = arith.constant 1 : index
    %238 = memref.load %arg12[%c1_91] : memref<8xf32, #tpu.memory_space<smem>>
    memref.store %118, %arg12[%c1_91] : memref<8xf32, #tpu.memory_space<smem>>
    %c2_92 = arith.constant 2 : index
    %239 = memref.load %arg12[%c2_92] : memref<8xf32, #tpu.memory_space<smem>>
    memref.store %142, %arg12[%c2_92] : memref<8xf32, #tpu.memory_space<smem>>
    %c3_93 = arith.constant 3 : index
    %240 = memref.load %arg12[%c3_93] : memref<8xf32, #tpu.memory_space<smem>>
    memref.store %154, %arg12[%c3_93] : memref<8xf32, #tpu.memory_space<smem>>
    %c4_94 = arith.constant 4 : index
    %241 = memref.load %arg12[%c4_94] : memref<8xf32, #tpu.memory_space<smem>>
    memref.store %205, %arg12[%c4_94] : memref<8xf32, #tpu.memory_space<smem>>
    %c5_95 = arith.constant 5 : index
    %242 = memref.load %arg12[%c5_95] : memref<8xf32, #tpu.memory_space<smem>>
    memref.store %236, %arg12[%c5_95] : memref<8xf32, #tpu.memory_space<smem>>
    %cst_96 = arith.constant 0.000000e+00 : f32
    %c6_97 = arith.constant 6 : index
    %243 = memref.load %arg12[%c6_97] : memref<8xf32, #tpu.memory_space<smem>>
    memref.store %cst_96, %arg12[%c6_97] : memref<8xf32, #tpu.memory_space<smem>>
    %cst_98 = arith.constant 0.000000e+00 : f32
    %c7_99 = arith.constant 7 : index
    %244 = memref.load %arg12[%c7_99] : memref<8xf32, #tpu.memory_space<smem>>
    memref.store %cst_98, %arg12[%c7_99] : memref<8xf32, #tpu.memory_space<smem>>
    return
  }
}

</mosaic_0001>

<bundles_post_ra>
// kernel: tpu_custom_call.1
= control target key start
LH: loop header
LB: loop body
LE: loop exit
PB: predicated region body
PF: predicated region fallthrough
CT: control target
= control target key end

     0   :  { %17 = vsyncpa [#allocation3], 0  ;;  %s862_s0 = inlined_call_operand.hbm [shape: s32[4], index: 0, kind: input, shape index: {}]   ;;  %s863_s1 = inlined_call_operand.hbm [shape: s32[4], index: 1, kind: input, shape index: {}]   ;;  %s864_s2 = inlined_call_operand.hbm [shape: f32[8], index: 2, kind: input, shape index: {}]   ;;  %s865_s3 = inlined_call_operand.vmem [shape: f32[2,8], index: 3, kind: input, shape index: {}]   ;;  %s866_s4 = inlined_call_operand.vmem [shape: f32[2,8], index: 4, kind: input, shape index: {}]   ;;  %s867_s5 = inlined_call_operand.vmem [shape: f32[2,8], index: 5, kind: input, shape index: {}]   ;;  %s868_s6 = inlined_call_operand.vmem [shape: f32[2,8], index: 6, kind: input, shape index: {}]   ;;  %s869_s7 = inlined_call_operand.vmem [shape: f32[2,16], index: 7, kind: input, shape index: {}]   ;;  %s870_s8 = inlined_call_operand.vmem [shape: s32[2,2], index: 8, kind: input, shape index: {}]   ;;  %s871_s9 = inlined_call_operand.vmem [shape: s32[2,2], index: 9, kind: input, shape index: {}]   ;;  %s872_s10 = inlined_call_operand.vmem [shape: f32[2,8,32], index: 10, kind: input, shape index: {}]   ;;  %s873_s11 = inlined_call_operand.vmem [shape: f32[2,1,32], index: 11, kind: input, shape index: {}]   ;;  %s874_s12 = inlined_call_operand.hbm [shape: f32[8], index: 12, kind: output, shape index: {}]  }
   0x1   :  { %18 = vsyncpa [#allocation6], 0 }
   0x2   :  { %19 = vsyncpa [#allocation4], 0  ;;  %s534_s23 = scalar_lea.hbm %s863_s1, 16 }
   0x3   :  { %p535_p0 = scmp.ne.s32.totalorder %s863_s1, %s534_s23  ;;  %p538_p1 = scmp.lt.u32.totalorder %s534_s23, %s863_s1 }
   0x5   :  { %p540_p2 = pnand %p538_p1, %p535_p0 }
   0x7   :  { %543 = shalt.err (!%p540_p2)
}
   0x8   :  { %s580_s28 = smov [#allocation5]   ;;  %s544_s15 = scalar_lea.hbm %s862_s0, 16 }
   0x9   :  { %35 = dma.hbm_to_smem %s863_s1, 16, %s580_s28, [#allocation6]  }
   0xa   :  { %p545_p3 = scmp.ne.s32.totalorder %s862_s0, %s544_s15  ;;  %p548_p4 = scmp.lt.u32.totalorder %s544_s15, %s862_s0 }
   0xc   :  { %p550_p5 = pnand %p548_p4, %p545_p3 }
   0xe   :  { %553 = shalt.err (!%p550_p5)
}
   0xf   :  { %s581_s20 = smov [#allocation2]   ;;  %s554_s24 = scalar_lea.hbm %s864_s2, 16 }
  0x10   :  { %27 = dma.hbm_to_smem %s862_s0, 16, %s581_s20, [#allocation3]  }
  0x11   :  { %p555_p6 = scmp.ne.s32.totalorder %s864_s2, %s554_s24  ;;  %p558_p7 = scmp.lt.u32.totalorder %s554_s24, %s864_s2 }
  0x13   :  { %p560_p8 = pnand %p558_p7, %p555_p6 }
  0x15   :  { %563 = shalt.err (!%p560_p8)
}
  0x16   :  { %s582_s29 = smov [#allocation7]  }
  0x17   :  { %43 = dma.hbm_to_smem %s864_s2, 16, %s582_s29, [#allocation6]  }
  0x18   :  { %574 = dma.done.wait [#allocation3], 16  }
  0x19   :  { %575 = vsyncadd [#allocation3], 4294967280 }
  0x1a   :  { %576 = dma.done.wait [#allocation6], 32  }
  0x1b   :  { %577 = vsyncadd [#allocation6], 4294967264 }
  0x1c   :  { %71 = sfence }
  0x1d   :  { %v299_v0 = vld [vmem:[%s872_s10] sm:$0xff]  ;;  %vm317_vm0 = vcmask 261120   ;;  %v300_v2 = vld [vmem:[%s872_s10 + $0x8] sm:$0xff]  ;;  %v72_v3 = vlaneseq  ;;  %s78_s20 = sld [smem:[#allocation2]]  ;;  %s474_s22 = sld [smem:[#allocation2 + $0x1]]  ;;  %v583_v16 = vmov 0.0  }
  0x1e   :  { %v489_v1 = vld [vmem:[%s873_s11] ss:$0 sm:$0xff]  ;;  %v490_v5 = vld [vmem:[%s873_s11 + $0x1] ss:$0 sm:$0xff]  ;;  %s80_s21 = sld [smem:[#allocation5]]  ;;  %s476_s1 = sld [smem:[#allocation5 + $0x1]] }
  0x1f   :  { %v315_v4 = vmul.f32 %v489_v1, %v299_v0  ;;  %v316_v6 = vmul.f32 %v490_v5, %v300_v2  ;;  %v701_v7 = vshrl.u32 %v72_v3, 7  ;;  %v704_v9 = vand.u32 127, %v72_v3  ;;  %s479_s23 = sld [smem:[#allocation2 + $0x2]]  ;;  %s484_s10 = sld [smem:[#allocation2 + $0x3]]  ;;  %v235_v40 = vld [vmem:[%s871_s9] sm:$0x3] }
  0x20   :  { %s481_s24 = sld [smem:[#allocation5 + $0x2]]  ;;  %s486_s11 = sld [smem:[#allocation5 + $0x3]]  ;;  %vm361_vm5 = vcmask 1041409   ;;  %vm139_vm6 = vcmask 58368   ;;  %v584_v39 = vmov 1   ;;  %v585_v41 = vmov 0  }
  0x21   :  { %v318_v8 = vsel %vm317_vm0, %v315_v4, 0.0  ;;  %v76_v10 = vmul.u32 8, %v701_v7  ;;  %v321_v11 = vsel %vm317_vm0, %v316_v6, 0.0  ;;  %v336_v25 = vsub.s32 1, %v701_v7  ;;  %514 = vset.pattern.permute.xlu0 %v584_v39  ;;  %513 = vset.pattern.permute.xlu1 %v585_v41  ;;  %v234_v53 = vld [vmem:[%s870_s8] sm:$0x3] }
  0x22   :  { %319 = vadd.xlane.f32.xlu0 %v318_v8  ;;  %v740_v29 = vsub.s32 %v704_v9, %v701_v7  ;;  %v329_v37 = vsub.s32 0, %v701_v7  ;;  %s473_s17 = sld [smem:[#allocation7 + $0x1]]  ;;  %s478_s18 = sld [smem:[#allocation7 + $0x3]]  ;;  %v763_v57 = vld [vmem:[%s867_s5] sm:$0x3]  ;;  %vm241_vm8 = vcmask 123904  }
  0x23   :  { %v77_v12 = vadd.s32 %v76_v10, %v704_v9  ;;  %s472_s25 = sshll.u32 %s78_s20, 3  ;;  %s475_s27 = sshll.u32 %s474_s22, 3  ;;  %v768_v58 = vld [vmem:[%s868_s6] sm:$0x3]  ;;  %vm256_vm15 = vcmask 1024  }
  0x24   :  { %s81_s26 = sadd.s32 %s472_s25, %s80_s21  ;;  %s94_s28 = sadd.s32 %s476_s1, %s475_s27  ;;  %v192_v59 = vsub.f32 %v763_v57, %v768_v58  ;;  %vm217_vm13 = vcmp.ge.f32.partialorder %v763_v57, %v768_v58 }
  0x25   :  { %v82_v13 = vstv %s81_s26  ;;  %s480_s29 = sshll.u32 %s479_s23, 3  ;;  %v95_v15 = vstv %s94_s28  ;;  %s485_s13 = sshll.u32 %s484_s10, 3 }
  0x26   :  { %322 = vadd.xlane.f32.xlu0 %v321_v11  ;;  %vm709_vm1 = vcmp.eq.s32.totalorder %v77_v12, %v82_v13  ;;  %s107_s30 = sadd.s32 %s481_s24, %s480_s29  ;;  %vm716_vm2 = vcmp.eq.s32.totalorder %v77_v12, %v95_v15  ;;  %s120_s0 = sadd.s32 %s486_s11, %s485_s13  ;;  %v193_v63 = vand.u32 2147483647, %v192_v59  ;;  %v789_v11 = vld [vmem:[%s866_s4] sm:$0x3] }
  0x27   :  { %v84_v17 = vsel %vm709_vm1, 1.0, %v583_v16  ;;  %v108_v19 = vstv %s107_s30  ;;  %v121_v22 = vstv %s120_s0  ;;  %s85_s2 = sld [smem:[#allocation7]]  ;;  %s483_s19 = sld [smem:[#allocation7 + $0x5]]  ;;  %v151_v15 = vmul.f32 0.5, %v789_v11 }
  0x28   :  { %v97_v20 = vsel %vm716_vm2, 1.0, %v84_v17  ;;  %vm722_vm3 = vcmp.eq.s32.totalorder %v77_v12, %v108_v19  ;;  %vm728_vm4 = vcmp.eq.s32.totalorder %v77_v12, %v121_v22  ;;  %s477_s20 = sld [smem:[#allocation7 + $0x2]]  ;;  %s488_s21 = sld [smem:[#allocation7 + $0x7]]  ;;  %v89_v60 = vstv %s473_s17  ;;  %v131_v19 = vld [vmem:[%s865_s3] sm:$0x3] }
  0x29   :  { %v110_v23 = vsel %vm722_vm3, 1.0, %v97_v20  ;;  %s482_s8 = sld [smem:[#allocation7 + $0x4]]  ;;  %s487_s10 = sld [smem:[#allocation7 + $0x6]]  ;;  %v90_v61 = vsel %vm709_vm1, %v89_v60, 0.0  ;;  %v102_v62 = vstv %s478_s18  ;;  %v194_v12 = vsub.f32 0.0, %v193_v63 }
  0x2a   :  { %v735_v26 = vsel %vm728_vm4, 1.0, %v110_v23  ;;  %v103_v1 = vsel %vm716_vm2, %v102_v62, %v90_v61  ;;  %v152_v23 = vsub.f32 %v131_v19, %v151_v15  ;;  %s586_s9 = smov 0.0   ;;  %s564_s1 = scalar_lea.hbm %s874_s12, 16 }
  0x2b   :  { %v337_v27 = vrot.slane %v735_v26, %v336_v25  ;;  %v330_v38 = vrot.slane %v735_v26, %v329_v37  ;;  %v367_v56 = vsel %vm139_vm6, %v735_v26, 0.0  ;;  %v195_v20 = vmul.f32 1.442695, %v194_v12  ;;  %454 = sst [smem:[#allocation8 + $0x6]] %s586_s9  ;;  %p565_p9 = scmp.ne.s32.totalorder %s874_s12, %s564_s1 }
  0x2c   :  { %vm130_vm10 = vcmp.gt.f32.partialorder %v735_v26, 0.5  ;;  %456 = sst [smem:[#allocation8 + $0x7]] %s586_s9  ;;  %p568_p10 = scmp.lt.u32.totalorder %s564_s1, %s874_s12 }
  0x2d   :  { %v86_v0 = vstv %s85_s2  ;;  %v115_v2 = vstv %s483_s19  ;;  %vm218_vm14 = vmand %vm130_vm10, %vm217_vm13 }
  0x2e   :  { %v87_v3 = vsel %vm709_vm1, %v86_v0, 0.0  ;;  %v99_v4 = vstv %s477_s20  ;;  %v116_v5 = vsel %vm722_vm3, %v115_v2, %v103_v1  ;;  %v128_v6 = vstv %s488_s21  ;;  %p570_p11 = pnand %p568_p10, %p565_p9 }
  0x2f   :  { %v100_v7 = vsel %vm716_vm2, %v99_v4, %v87_v3  ;;  %v112_v8 = vstv %s482_s8  ;;  %v784_v10 = vsel %vm728_vm4, %v128_v6, %v116_v5  ;;  %v125_v14 = vstv %s487_s10 }
  0x30   :  { %v113_v13 = vsel %vm722_vm3, %v112_v8, %v100_v7  ;;  %v154_v17 = vmul.f32 0.5, %v784_v10  ;;  %v135_v1 = vsub.f32 %v789_v11, %v784_v10 }
  0x31   :  { %v126_v18 = vsel %vm728_vm4, %v125_v14, %v113_v13 }
  0x32   :  { %v133_v0 = vsub.f32 %v131_v19, %v126_v18  ;;  %v136_v6 = vand.u32 2147483647, %v135_v1 }
  0x34   :  { %v134_v5 = vand.u32 2147483647, %v133_v0 }
  0x36   :  { %v137_v14 = vadd.f32 %v136_v6, %v134_v5 }
  0x3c   :  { %339 = vbcast.lane.b32.xlu0 %v337_v27, 256  ;;  %v155_v27 = vsub.f32 %v126_v18, %v154_v17 }
  0x40   :  { %277 = vperm.xlu0 %514, %v235_v40  }
  0x44   :  { %516 = vset.pattern.permute.xlu0 %v585_v41 }
  0xaf   :  { %v320_v28 = vpop.xlane.xlu0 %319 }
  0xb0   :  { %v324_v30 = vmul.f32 14.285714, %v320_v28  ;;  %v156_v28 = vadd.f32 %v154_v17, %v126_v18  ;;  %v191_v17 = vmax.f32 %v763_v57, %v768_v58  ;;  %v138_v18 = vmul.f32 %v137_v14, %v735_v26 }
  0xb2   :  { %v376_v33 = vrot.slane %v324_v30, %v740_v29 }
  0xb3   :  { %v323_v31 = vpop.xlane.xlu0 %322 }
  0xb4   :  { %v325_v32 = vmul.f32 14.285714, %v323_v31 }
  0xb6   :  { %v380_v34 = vrot.slane %v325_v32, %v740_v29 }
  0xb7   :  { %v340_v54 = vpop.permute.xlu0 %339 }
  0xb8   :  { %v381_v35 = vsel %vm361_vm5, %v380_v34, %v376_v33  ;;  %v344_v55 = vmul.f32 %v340_v54, %v325_v32  ;;  %v162_v34 = vsub.f32 %v156_v28, %v155_v27 }
  0xb9   :  { %v383_v36 = vsel %vm139_vm6, %v381_v35, -inf }
  0xba   :  { %384 = vmax.xlane.f32.xlu1 %v383_v36 }
  0xbf   :  { %v278_v36 = vpop.permute.xlu0 %277 }
  0xc0   :  { %vm279_vm7 = vcmp.eq.s32.totalorder %v704_v9, %v278_v36 }
  0xcb   :  { %332 = vbcast.lane.b32.xlu1 %v330_v38, 256 }
 0x147   :  { %v751_v42 = vpop.xlane.xlu1 %384 }
 0x148   :  { %v390_v43 = vrot.slane %v751_v42, %v329_v37  ;;  %v394_v44 = vrot.slane %v751_v42, %v336_v25  ;;  %v153_v25 = vadd.f32 %v151_v15, %v131_v19 }
 0x14a   :  { %v397_v45 = vsub.f32 %v324_v30, %v390_v43  ;;  %v398_v46 = vsub.f32 %v325_v32, %v394_v44  ;;  %v157_v21 = vmin.f32 %v153_v25, %v156_v28  ;;  %v161_v33 = vsub.f32 %v153_v25, %v152_v23  ;;  %v233_v43 = vld [vmem:[%s869_s7] sm:$0x3] }
 0x14b   :  { %v333_v47 = vpop.permute.xlu1 %332 }
 0x14c   :  { %v399_v48 = vmul.f32 1.442695, %v397_v45  ;;  %v343_v49 = vmul.f32 %v333_v47, %v324_v30  ;;  %v401_v50 = vmul.f32 1.442695, %v398_v46  ;;  %v158_v30 = vmax.f32 %v152_v23, %v155_v27 }
 0x14d   :  { %v163_v38 = vadd.f32 %v162_v34, %v161_v33 }
 0x14e   :  { %518 = vpow2.f32 %v399_v48  ;;  %348 = vperm.xlu0 %516, %v343_v49   ;;  %v159_v32 = vsub.f32 %v157_v21, %v158_v30 }
 0x14f   :  { %520 = vpow2.f32 %v401_v50 }
 0x150   :  { %522 = vpow2.f32 %v195_v20  ;;  %v160_v37 = vmax.f32 %v159_v32, 0.0 }
 0x152   :  { %v164_v46 = vsub.f32 %v163_v38, %v160_v37 }
 0x154   :  { %v168_v49 = vsel %vm130_vm10, %v164_v46, 1.0 }
 0x155   :  { %524 = vrcp.f32 %v168_v49 }
 0x158   :  { %v519_v51 = vpop.eup %518 }
 0x159   :  { %406 = vperm.xlu1 %513, %v519_v51   ;;  %v521_v52 = vpop.eup %520 }
 0x15a   :  { %v523_v51 = vpop.eup %522 }
 0x15d   :  { %409 = vperm.xlu1 %513, %v521_v52  }
 0x15f   :  { %v525_v4 = vpop.eup %524 }
 0x160   :  { %v171_v13 = vmul.f32 %v525_v4, %v160_v37 }
 0x161   :  { %246 = vperm.xlu1 %513, %v235_v40   ;;  %v166_v40 = vmin.f32 %v152_v23, %v155_v27  ;;  %v201_v23 = vsel %vm130_vm10, %v763_v57, %v768_v58 }
 0x165   :  { %237 = vperm.xlu1 %513, %v234_v53  }
 0x169   :  { %515 = vset.pattern.permute.xlu1 %v584_v39  ;;  %v165_v39 = vmax.f32 %v153_v25, %v156_v28  ;;  %v140_v25 = vsel %vm139_vm6, %v138_v18, 0.0 }
 0x16a   :  { %269 = vperm.xlu1 %515, %v234_v53   ;;  %v280_v53 = vsel %vm279_vm7, %v233_v43, 0.0 }
 0x16b   :  { %v167_v47 = vsub.f32 %v165_v39, %v166_v40  ;;  %v281_v59 = vsel %vm241_vm8, %v280_v53, 0.0 }
 0x16d   :  { %v169_v50 = vsel %vm130_vm10, %v167_v47, 1.0  ;;  %v172_v3 = vsub.f32 %v167_v47, %v164_v46 }
 0x16e   :  { %517 = vset.pattern.permute.xlu1 %v585_v41  ;;  %526 = vrcp.f32 %v169_v50 }
 0x16f   :  { %351 = vperm.xlu1 %517, %v344_v55   ;;  %v197_v55 = vadd.f32 1.0, %v523_v51 }
 0x171   :  { %528 = vlog2.f32 %v197_v55 }
 0x178   :  { %v527_v7 = vpop.eup %526 }
 0x179   :  { %v174_v15 = vmul.f32 %v527_v7, %v172_v3 }
 0x17b   :  { %v529_v10 = vpop.eup %528  ;;  %v175_v19 = vsub.f32 %v171_v13, %v174_v15 }
 0x17c   :  { %v199_v20 = vmul.f32 0.6931472, %v529_v10 }
 0x17d   :  { %v176_v27 = vsub.f32 1.0, %v175_v19 }
 0x17e   :  { %v200_v28 = vadd.f32 %v199_v20, %v191_v17 }
 0x17f   :  { %v177_v30 = vmul.f32 %v176_v27, %v735_v26 }
 0x181   :  { %v178_v32 = vsel %vm139_vm6, %v177_v30, 0.0 }
 0x193   :  { %368 = vadd.xlane.f32.xlu1 %v367_v56 }
 0x1cd   :  { %v349_v62 = vpop.permute.xlu0 %348 }
 0x1ce   :  { %v356_v8 = vrot.slane %v349_v62, %v740_v29 }
 0x1d8   :  { %v407_v22 = vpop.permute.xlu1 %406 }
 0x1d9   :  { %v414_v24 = vrot.slane %v407_v22, %v740_v29 }
 0x1dc   :  { %v410_v31 = vpop.permute.xlu1 %409 }
 0x1dd   :  { %v418_v35 = vrot.slane %v410_v31, %v740_v29  ;;  %v202_v31 = vsub.f32 %v200_v28, %v201_v23 }
 0x1df   :  { %v419_v41 = vsel %vm361_vm5, %v418_v35, %v414_v24  ;;  %v219_v24 = vsel %vm218_vm14, 1.0, %v583_v16 }
 0x1e0   :  { %v247_v44 = vpop.permute.xlu1 %246  ;;  %v421_v45 = vsel %vm139_vm6, %v419_v41, 0.0  ;;  %v220_v35 = vsel %vm139_vm6, %v219_v24, 0.0 }
 0x1e1   :  { %vm248_vm9 = vcmp.eq.s32.totalorder %v704_v9, %v247_v44  ;;  %422 = vadd.xlane.f32.xlu0 %v421_v45 }
 0x1e2   :  { %v249_v48 = vsel %vm248_vm9, %v233_v43, 0.0 }
 0x1e3   :  { %v250_v52 = vsel %vm241_vm8, %v249_v48, 0.0 }
 0x1e4   :  { %v238_v54 = vpop.permute.xlu1 %237 }
 0x1e5   :  { %vm239_vm11 = vcmp.eq.s32.totalorder %v704_v9, %v238_v54  ;;  %251 = vadd.xlane.f32.xlu0 %v250_v52 }
 0x1e6   :  { %v240_v56 = vsel %vm239_vm11, %v233_v43, 0.0 }
 0x1e7   :  { %v242_v60 = vsel %vm241_vm8, %v240_v56, 0.0 }
 0x1e8   :  { %243 = vadd.xlane.f32.xlu1 %v242_v60 }
 0x1e9   :  { %282 = vadd.xlane.f32.xlu0 %v281_v59  ;;  %v270_v61 = vpop.permute.xlu1 %269 }
 0x1ea   :  { %vm271_vm12 = vcmp.eq.s32.totalorder %v704_v9, %v270_v61 }
 0x1eb   :  { %v272_v63 = vsel %vm271_vm12, %v233_v43, 0.0 }
 0x1ec   :  { %v273_v2 = vsel %vm241_vm8, %v272_v63, 0.0 }
 0x1ed   :  { %274 = vadd.xlane.f32.xlu0 %v273_v2 }
 0x1ee   :  { %v352_v12 = vpop.permute.xlu1 %351 }
 0x1ef   :  { %v360_v9 = vrot.slane %v352_v12, %v740_v29  ;;  %v203_v29 = vmul.f32 0.9, %v735_v26 }
 0x1f1   :  { %v362_v11 = vsel %vm361_vm5, %v360_v9, %v356_v8  ;;  %141 = vadd.xlane.f32.xlu0 %v140_v25  ;;  %v204_v21 = vadd.f32 0.1, %v203_v29 }
 0x1f2   :  { %v364_v22 = vsel %vm139_vm6, %v362_v11, 0.0 }
 0x1f3   :  { %365 = vadd.xlane.f32.xlu1 %v364_v22  ;;  %v205_v33 = vmul.f32 %v204_v21, %v202_v31 }
 0x1f5   :  { %v206_v34 = vsel %vm139_vm6, %v205_v33, 0.0 }
 0x1f6   :  { %207 = vadd.xlane.f32.xlu0 %v206_v34 }
 0x1f7   :  { %179 = vadd.xlane.f32.xlu1 %v178_v32 }
 0x1fb   :  { %221 = vadd.xlane.f32.xlu1 %v220_v35 }
 0x220   :  { %v369_v37 = vpop.xlane.xlu1 %368 }
 0x221   :  { %v370_v38 = vmax.f32 %v369_v37, 1.0 }
 0x26e   :  { %v423_v36 = vpop.xlane.xlu0 %422 }
 0x26f   :  { %530 = vlog2.f32 %v423_v36 }
 0x270   :  { %532 = vrcp.f32 %v370_v38 }
 0x272   :  { %v252_v39 = vpop.xlane.xlu0 %251 }
 0x273   :  { %v253_v40 = vadd.f32 1.0, %v252_v39 }
 0x275   :  { %v244_v57 = vpop.xlane.xlu1 %243 }
 0x276   :  { %v254_v58 = vsub.f32 %v253_v40, %v244_v57  ;;  %v283_v41 = vpop.xlane.xlu0 %282 }
 0x277   :  { %v284_v26 = vadd.f32 1.0, %v283_v41 }
 0x278   :  { %v255_v43 = vmax.f32 %v254_v58, 0.0 }
 0x279   :  { %v531_v44 = vpop.eup %530 }
 0x27a   :  { %v275_v45 = vpop.xlane.xlu0 %274  ;;  %v257_v16 = vsel %vm256_vm15, %v255_v43, 0.0  ;;  %v425_v47 = vmul.f32 0.6931472, %v531_v44  ;;  %v533_v49 = vpop.eup %532 }
 0x27b   :  { %v285_v46 = vsub.f32 %v284_v26, %v275_v45  ;;  %258 = vadd.xlane.f32.xlu0 %v257_v16 }
 0x27c   :  { %v426_v53 = vadd.f32 %v425_v47, %v751_v42 }
 0x27d   :  { %v286_v48 = vmax.f32 %v285_v46, 0.0 }
 0x27e   :  { %v142_v54 = vpop.xlane.xlu0 %141 }
 0x27f   :  { %v287_v50 = vsel %vm256_vm15, %v286_v48, 0.0  ;;  %v143_v55 = vrot.slane %v142_v54, 4 }
 0x280   :  { %v366_v51 = vpop.xlane.xlu1 %365  ;;  %288 = vadd.xlane.f32.xlu1 %v287_v50 }
 0x281   :  { %v428_v52 = vmul.f32 %v533_v49, %v366_v51  ;;  %v144_v59 = vadd.f32 %v143_v55, %v142_v54 }
 0x283   :  { %v429_v56 = vsub.f32 %v426_v53, %v428_v52  ;;  %v145_v62 = vrot.slane %v144_v59, 2  ;;  %v208_v0 = vpop.xlane.xlu0 %207 }
 0x284   :  { %v180_v61 = vpop.xlane.xlu1 %179  ;;  %v209_v2 = vrot.slane %v208_v0, 4 }
 0x285   :  { %v430_v60 = vsel %vm256_vm15, %v429_v56, 0.0  ;;  %v181_v63 = vrot.slane %v180_v61, 4  ;;  %v146_v4 = vadd.f32 %v145_v62, %v144_v59 }
 0x286   :  { %431 = vadd.xlane.f32.xlu0 %v430_v60  ;;  %v210_v6 = vadd.f32 %v209_v2, %v208_v0 }
 0x287   :  { %v182_v1 = vadd.f32 %v181_v63, %v180_v61  ;;  %v147_v8 = vrot.slane %v146_v4, 1 }
 0x288   :  { %v222_v3 = vpop.xlane.xlu1 %221  ;;  %v211_v42 = vrot.slane %v210_v6, 2 }
 0x289   :  { %v183_v5 = vrot.slane %v182_v1, 2  ;;  %v223_v7 = vrot.slane %v222_v3, 4  ;;  %v148_v9 = vadd.f32 %v147_v8, %v146_v4 }
 0x28a   :  { %v212_v17 = vadd.f32 %v211_v42, %v210_v6 }
 0x28b   :  { %v224_v12 = vadd.f32 %v223_v7, %v222_v3  ;;  %v184_v13 = vadd.f32 %v183_v5, %v182_v1  ;;  %491 = vpush %v148_v9 }
 0x28c   :  { %v213_v11 = vrot.slane %v212_v17, 1 }
 0x28d   :  { %v225_v14 = vrot.slane %v224_v12, 2  ;;  %v185_v15 = vrot.slane %v184_v13, 1 }
 0x28e   :  { %v214_v19 = vadd.f32 %v213_v11, %v212_v17 }
 0x28f   :  { %v186_v10 = vadd.f32 %v185_v15, %v184_v13  ;;  %v226_v18 = vadd.f32 %v225_v14, %v224_v12 }
 0x291   :  { %493 = vpush %v186_v10  ;;  %v227_v20 = vrot.slane %v226_v18, 1 }
 0x292   :  { %495 = vpush %v214_v19 }
 0x293   :  { %v228_v22 = vadd.f32 %v227_v20, %v226_v18 }
 0x295   :  { %497 = vpush %v228_v22 }
 0x2bc   :  { %s492_s7 = spop %491 }
 0x2bd   :  { %s150_s26 = smul.f32 0.125, %s492_s7 }
 0x2bf   :  { %442 = sst [smem:[#allocation8]] %s150_s26 }
 0x2c2   :  { %s494_s27 = spop %493 }
 0x2c3   :  { %s188_s28 = smul.f32 0.25, %s494_s27  ;;  %s496_s29 = spop %495 }
 0x2c4   :  { %s216_s30 = smul.f32 0.0625, %s496_s29 }
 0x2c5   :  { %444 = sst [smem:[#allocation8 + $0x1]] %s188_s28 }
 0x2c6   :  { %s498_s13 = spop %497  ;;  %446 = sst [smem:[#allocation8 + $0x2]] %s216_s30 }
 0x2c7   :  { %s230_s0 = smul.f32 100.0, %s498_s13 }
 0x2c9   :  { %s231_s14 = smul.f32 0.25, %s230_s0 }
 0x2cb   :  { %s232_s15 = ssub.f32 100.0, %s231_s14 }
 0x2cd   :  { %448 = sst [smem:[#allocation8 + $0x3]] %s232_s15 }
 0x308   :  { %v259_v23 = vpop.xlane.xlu0 %258 }
 0x309   :  { %v260_v29 = vrot.slane %v259_v23, 4 }
 0x30b   :  { %v261_v25 = vadd.f32 %v260_v29, %v259_v23 }
 0x30d   :  { %v262_v27 = vrot.slane %v261_v25, 2  ;;  %v289_v28 = vpop.xlane.xlu1 %288 }
 0x30e   :  { %v290_v21 = vrot.slane %v289_v28, 4 }
 0x30f   :  { %v263_v30 = vadd.f32 %v262_v27, %v261_v25 }
 0x310   :  { %v291_v31 = vadd.f32 %v290_v21, %v289_v28 }
 0x311   :  { %v264_v32 = vrot.slane %v263_v30, 1 }
 0x312   :  { %v292_v33 = vrot.slane %v291_v31, 2 }
 0x313   :  { %v432_v34 = vpop.xlane.xlu0 %431  ;;  %v265_v24 = vadd.f32 %v264_v32, %v263_v30 }
 0x314   :  { %v293_v35 = vadd.f32 %v292_v33, %v291_v31  ;;  %v433_v36 = vrot.slane %v432_v34, 4 }
 0x315   :  { %499 = vpush %v265_v24 }
 0x316   :  { %v434_v37 = vadd.f32 %v433_v36, %v432_v34  ;;  %v294_v38 = vrot.slane %v293_v35, 1 }
 0x318   :  { %v435_v39 = vrot.slane %v434_v37, 2  ;;  %v295_v40 = vadd.f32 %v294_v38, %v293_v35 }
 0x31a   :  { %v436_v57 = vadd.f32 %v435_v39, %v434_v37  ;;  %501 = vpush %v295_v40 }
 0x31c   :  { %v437_v58 = vrot.slane %v436_v57, 1 }
 0x31e   :  { %v438_v41 = vadd.f32 %v437_v58, %v436_v57 }
 0x320   :  { %503 = vpush %v438_v41 }
 0x346   :  { %s500_s16 = spop %499 }
 0x34b   :  { %s502_s17 = spop %501 }
 0x34c   :  { %s297_s18 = sadd.f32 %s502_s17, %s500_s16 }
 0x34e   :  { %s298_s2 = smul.f32 0.5, %s297_s18 }
 0x350   :  { %450 = sst [smem:[#allocation8 + $0x4]] %s298_s2 }
 0x351   :  { %s504_s19 = spop %503 }
 0x352   :  { %s440_s20 = smul.f32 0.5, %s504_s19 }
 0x354   :  { %452 = sst [smem:[#allocation8 + $0x5]] %s440_s20 }
 0x355   :  { %573 = shalt.err (!%p570_p11)
}
 0x356   :  { %s587_s5 = smov [#allocation8]  }
 0x357   :  { %464 = dma.smem_to_hbm %s587_s5, 16, %s874_s12, [#allocation4]  }
 0x358   :  { %578 = dma.done.wait [#allocation4], 16  }
 0x359   :  { %579 = vsyncadd [#allocation4], 4294967280 }
 0x35a   :  { %468 = sfence }
 0x35b   :  { %469 = vsyncpa [#allocation3], 1 }
 0x35c   :  { %470 = vsyncpa [#allocation6], 1 }
 0x35d   :  { %471 = vsyncpa [#allocation4], 1 }

</bundles_post_ra>
